<compile_context>
chip_gen: v7x
topology: tpu7x:2x2x1
jax: 0.10.0
libtpu: 0.0.40
codegen_flags: <defaults>
</compile_context>

<pallas_src>
import functools

import jax
import jax.numpy as jnp
from jax.experimental import pallas as pl
from jax.experimental.pallas import tpu as pltpu


def _block_kernel(x_ref, w_ref, gs_ref, o_ref, *, K, L, C_in, pad):
    """Fused Conv1d(+bias) -> RMSNorm(channel) -> SiLU for ONE batch row (NCL).

    x_ref  : (1, C_in, L)        input row (positions on the lane axis)
    w_ref  : (C_out, K*C_in+1)   conv weight in im2col order (row = k*C_in+ci)
                                 with the bias column appended
    gs_ref : (C_out, 1)          RMSNorm gain pre-folded with sqrt(C_out)
    o_ref  : (1, C_out, L)       output row (NCL)
    """
    dot_dtype = w_ref.dtype
    x = x_ref[0].astype(dot_dtype)                               # (C_in, L)

    # Zero-padded row built as a VALUE (no scratch ref, no masked halo stores);
    # the K shifted views are static lane slices (lane shifts, vst-free).
    halo = jnp.zeros((C_in, pad), dot_dtype)
    xpad = jnp.concatenate([halo, x, halo], axis=-1)             # (C_in, L+2*pad)
    taps = [xpad[:, k:k + L] for k in range(K)]                  # K shifted views
    taps.append(jnp.ones((1, L), dot_dtype))                     # ones row -> folds bias
    col = jnp.concatenate(taps, axis=0)                          # (K*C_in+1, L)

    # Conv1d + bias as ONE MXU matmul with a (K*C_in+1)-deep contraction.
    # TODO(synk): at production C_in (>=128) replace the materialized slab with
    # K accumulating shifted dots (contraction depth C_in already fills the MXU).
    acc = jnp.dot(w_ref[...], col, preferred_element_type=jnp.float32)  # (C_out, L)

    # RMSNorm over channels (sublane axis):
    #   F.normalize(dim=1) * g * sqrt(C_out)
    #   == x * rsqrt(max(sum(x^2), 1e-24)) * (g * sqrt(C_out))
    ss = jnp.sum(acc * acc, axis=0, keepdims=True)               # (1, L)
    y = acc * jax.lax.rsqrt(jnp.maximum(ss, 1e-24)) * gs_ref[...]

    # SiLU (sigmoid hits the EUP), one contiguous store of the whole row.
    o_ref[0] = (y * jax.nn.sigmoid(y)).astype(o_ref.dtype)


def block_forward(x_ncl, weight, bias, g, *, kernel_size, matmul_dtype=None):
    """x_ncl: (B, C_in, L) float32 (PyTorch NCL layout). Returns (B, C_out, L).

    matmul_dtype: e.g. jnp.bfloat16 to feed the MXU bf16 operands (accumulation
    and the RMSNorm/SiLU epilogue remain f32). Default keeps f32 so the 1e-5
    reference check holds at toy sizes.
    """
    B, C_in, L = x_ncl.shape
    C_out = weight.shape[0]
    K = kernel_size
    assert K % 2 == 1, "even K changes PyTorch Conv1d(padding=K//2) output length"
    pad = K // 2

    dot_dtype = jnp.float32 if matmul_dtype is None else matmul_dtype

    # PyTorch Conv1d weight (C_out, C_in, K) -> im2col layout (C_out, K*C_in)
    # with row order k*C_in + ci, then append the bias column so the ones-row
    # in the im2col operand folds the bias add into the matmul.
    w2 = jnp.transpose(weight, (0, 2, 1)).reshape(C_out, K * C_in)
    w_aug = jnp.concatenate([w2, bias.reshape(C_out, 1)], axis=1).astype(dot_dtype)
    # Pre-fold g * sqrt(C_out) so the kernel does one fused multiply.
    gs_col = (g.reshape(-1) * (C_out ** 0.5)).reshape(C_out, 1).astype(jnp.float32)

    kernel = functools.partial(_block_kernel, K=K, L=L, C_in=C_in, pad=pad)

    return pl.pallas_call(
        kernel,
        out_shape=jax.ShapeDtypeStruct((B, C_out, L), x_ncl.dtype),
        grid_spec=pltpu.PrefetchScalarGridSpec(
            num_scalar_prefetch=0,
            grid=(B,),                       # one batch row per grid step
            in_specs=[
                pl.BlockSpec((1, C_in, L), lambda b: (b, 0, 0)),
                pl.BlockSpec((C_out, K * C_in + 1), lambda b: (0, 0)),
                pl.BlockSpec((C_out, 1), lambda b: (0, 0)),
            ],
            out_specs=pl.BlockSpec((1, C_out, L), lambda b: (b, 0, 0)),
        ),
        compiler_params=pltpu.CompilerParams(
            dimension_semantics=("parallel",),
            # 32 MiB scoped VMEM is safe on v5e/v6e/v7x; raise alongside the
            # production L-tile sizing (see TODO at top of file).
            vmem_limit_bytes=32 * 1024 * 1024,
        ),
    )(x_ncl, w_aug, gs_col)


def _reference(x_ncl, weight, bias, g, *, kernel_size):
    """Plain-JAX reference mirroring the PyTorch Block forward."""
    pad = kernel_size // 2
    y = jax.lax.conv_general_dilated(
        x_ncl, weight, window_strides=(1,), padding=[(pad, pad)],
        dimension_numbers=("NCH", "OIH", "NCH"))
    y = y + bias[None, :, None]
    l2 = jnp.maximum(jnp.sqrt(jnp.sum(y * y, axis=1, keepdims=True)), 1e-12)
    y = y / l2 * g.reshape(-1)[None, :, None] * (y.shape[1] ** 0.5)
    return y * jax.nn.sigmoid(y)


if __name__ == "__main__":
    # Small shapes consistent with the module: Block(dim=4, dim_out=8, K=9).
    B, C_in, C_out, L, K = 2, 4, 8, 16, 9

    key = jax.random.PRNGKey(0)
    kx, kw, kb = jax.random.split(key, 3)

    x = jax.random.normal(kx, (B, C_in, L), dtype=jnp.float32)
    # Deterministic synthetic parameters (Conv1d-style uniform init).
    fan_in = C_in * K
    bound = 1.0 / (fan_in ** 0.5)
    weight = jax.random.uniform(kw, (C_out, C_in, K), jnp.float32, -bound, bound)
    bias = jax.random.uniform(kb, (C_out,), jnp.float32, -bound, bound)
    g = jnp.ones((C_out,), dtype=jnp.float32)  # RMSNorm.g init = ones

    out = block_forward(x, weight, bias, g, kernel_size=K)
    out = jax.block_until_ready(out)

    ref = _reference(x, weight, bias, g, kernel_size=K)
    assert out.shape == (B, C_out, L), out.shape
    assert jnp.allclose(out, ref, atol=1e-5, rtol=1e-5), "mismatch vs reference"

    print("KERNEL_OK")
</pallas_src>

<mosaic_0001>
module attributes {stable_mosaic.version = 11 : i64} {
  func.func @_block_kernel(%arg0: i32, %arg1: memref<1x4x16xf32, #tpu.memory_space<vmem>>, %arg2: memref<8x37xf32, #tpu.memory_space<vmem>>, %arg3: memref<8x1xf32, #tpu.memory_space<vmem>>, %arg4: memref<1x8x16xf32, #tpu.memory_space<vmem>>) attributes {dimension_semantics = [#tpu.dimension_semantics<parallel>], iteration_bounds = array<i64: 2>, scalar_prefetch = 0 : i64, scratch_operands = 0 : i64, tpu.core_type = #tpu.core_type<tc>, window_params = [{transform_indices = @transform_0, window_bounds = array<i64: 1, 4, 16>}, {pipeline_mode = #tpu.pipeline_mode<synchronous>, transform_indices = @transform_1, window_bounds = array<i64: 8, 37>}, {pipeline_mode = #tpu.pipeline_mode<synchronous>, transform_indices = @transform_2, window_bounds = array<i64: 8, 1>}, {transform_indices = @transform_3, window_bounds = array<i64: 1, 8, 16>}]} {
    %c0 = arith.constant 0 : index
    %c0_0 = arith.constant 0 : index
    %c0_1 = arith.constant 0 : index
    %0 = vector.load %arg1[%c0, %c0_0, %c0_1] : memref<1x4x16xf32, #tpu.memory_space<vmem>>, vector<1x4x16xf32>
    %1 = vector.shape_cast %0 : vector<1x4x16xf32> to vector<4x16xf32>
    %cst = arith.constant 0.000000e+00 : f32
    %2 = vector.broadcast %cst : f32 to vector<4x4xf32>
    %3 = tpu.concatenate %2, %1, %2 in 1 : vector<4x4xf32>, vector<4x16xf32>, vector<4x4xf32> -> vector<4x24xf32>
    %4 = vector.extract_strided_slice %3 {offsets = [0, 0], sizes = [4, 16], strides = [1, 1]} : vector<4x24xf32> to vector<4x16xf32>
    %5 = vector.extract_strided_slice %3 {offsets = [0, 1], sizes = [4, 16], strides = [1, 1]} : vector<4x24xf32> to vector<4x16xf32>
    %6 = vector.extract_strided_slice %3 {offsets = [0, 2], sizes = [4, 16], strides = [1, 1]} : vector<4x24xf32> to vector<4x16xf32>
    %7 = vector.extract_strided_slice %3 {offsets = [0, 3], sizes = [4, 16], strides = [1, 1]} : vector<4x24xf32> to vector<4x16xf32>
    %8 = vector.extract_strided_slice %3 {offsets = [0, 4], sizes = [4, 16], strides = [1, 1]} : vector<4x24xf32> to vector<4x16xf32>
    %9 = vector.extract_strided_slice %3 {offsets = [0, 5], sizes = [4, 16], strides = [1, 1]} : vector<4x24xf32> to vector<4x16xf32>
    %10 = vector.extract_strided_slice %3 {offsets = [0, 6], sizes = [4, 16], strides = [1, 1]} : vector<4x24xf32> to vector<4x16xf32>
    %11 = vector.extract_strided_slice %3 {offsets = [0, 7], sizes = [4, 16], strides = [1, 1]} : vector<4x24xf32> to vector<4x16xf32>
    %12 = vector.extract_strided_slice %3 {offsets = [0, 8], sizes = [4, 16], strides = [1, 1]} : vector<4x24xf32> to vector<4x16xf32>
    %cst_2 = arith.constant 1.000000e+00 : f32
    %13 = vector.broadcast %cst_2 : f32 to vector<1x16xf32>
    %14 = tpu.concatenate %4, %5, %6, %7, %8, %9, %10, %11, %12, %13 in 0 : vector<4x16xf32>, vector<4x16xf32>, vector<4x16xf32>, vector<4x16xf32>, vector<4x16xf32>, vector<4x16xf32>, vector<4x16xf32>, vector<4x16xf32>, vector<4x16xf32>, vector<1x16xf32> -> vector<37x16xf32>
    %c0_3 = arith.constant 0 : index
    %c0_4 = arith.constant 0 : index
    %15 = vector.load %arg2[%c0_3, %c0_4] : memref<8x37xf32, #tpu.memory_space<vmem>>, vector<8x37xf32>
    %cst_5 = arith.constant dense<0.000000e+00> : vector<8x16xf32>
    %16 = tpu.matmul %15, %14, %cst_5 {dimension_numbers = #tpu.dot_dimension_numbers<[1], [0], [0], [1], [0, 0, 1, 1], [], []>} : vector<8x37xf32>, vector<37x16xf32>, vector<8x16xf32> -> vector<8x16xf32>
    %17 = arith.mulf %16, %16 : vector<8x16xf32>
    %cst_6 = arith.constant dense<0.000000e+00> : vector<16xf32>
    %18 = vector.multi_reduction <add>, %17, %cst_6 [0] : vector<8x16xf32> to vector<16xf32>
    %19 = vector.shape_cast %18 : vector<16xf32> to vector<1x16xf32>
    %cst_7 = arith.constant 1.000000e-24 : f32
    %20 = vector.broadcast %cst_7 : f32 to vector<1x16xf32>
    %21 = arith.maximumf %19, %20 : vector<1x16xf32>
    %22 = math.rsqrt %21 : vector<1x16xf32>
    %23 = vector.broadcast %22 : vector<1x16xf32> to vector<8x16xf32>
    %24 = arith.mulf %16, %23 : vector<8x16xf32>
    %c0_8 = arith.constant 0 : index
    %c0_9 = arith.constant 0 : index
    %25 = vector.load %arg3[%c0_8, %c0_9] : memref<8x1xf32, #tpu.memory_space<vmem>>, vector<8x1xf32>
    %26 = vector.broadcast %25 : vector<8x1xf32> to vector<8x16xf32>
    %27 = arith.mulf %24, %26 : vector<8x16xf32>
    %28 = arith.negf %27 : vector<8x16xf32>
    %29 = math.exp %28 : vector<8x16xf32>
    %cst_10 = arith.constant 1.000000e+00 : f32
    %30 = vector.broadcast %cst_10 : f32 to vector<8x16xf32>
    %31 = arith.addf %30, %29 : vector<8x16xf32>
    %32 = arith.divf %30, %31 : vector<8x16xf32>
    %33 = arith.mulf %27, %32 : vector<8x16xf32>
    %c0_11 = arith.constant 0 : index
    %c0_12 = arith.constant 0 : index
    %c0_13 = arith.constant 0 : index
    %34 = vector.load %arg4[%c0_11, %c0_12, %c0_13] : memref<1x8x16xf32, #tpu.memory_space<vmem>>, vector<1x8x16xf32>
    %35 = vector.shape_cast %34 : vector<1x8x16xf32> to vector<8x16xf32>
    %36 = vector.shape_cast %33 : vector<8x16xf32> to vector<1x8x16xf32>
    tpu.vector_store %arg4[%c0_11, %c0_12, %c0_13], %36 {strides = array<i32>} : memref<1x8x16xf32, #tpu.memory_space<vmem>>, vector<1x8x16xf32>,
    return
  }
  func.func @transform_0(%arg0: i32) -> (i32, i32, i32) {
    %c0_i32 = arith.constant 0 : i32
    %c0_i32_0 = arith.constant 0 : i32
    %c0_i32_1 = arith.constant 0 : i32
    return %arg0, %c0_i32, %c0_i32_0 : i32, i32, i32
  }
  func.func @transform_1(%arg0: i32) -> (i32, i32) {
    %c0_i32 = arith.constant 0 : i32
    %c0_i32_0 = arith.constant 0 : i32
    %c0_i32_1 = arith.constant 0 : i32
    return %c0_i32, %c0_i32_0 : i32, i32
  }
  func.func @transform_2(%arg0: i32) -> (i32, i32) {
    %c0_i32 = arith.constant 0 : i32
    %c0_i32_0 = arith.constant 0 : i32
    %c0_i32_1 = arith.constant 0 : i32
    return %c0_i32, %c0_i32_0 : i32, i32
  }
  func.func @transform_3(%arg0: i32) -> (i32, i32, i32) {
    %c0_i32 = arith.constant 0 : i32
    %c0_i32_0 = arith.constant 0 : i32
    %c0_i32_1 = arith.constant 0 : i32
    return %arg0, %c0_i32, %c0_i32_0 : i32, i32, i32
  }
}

</mosaic_0001>

<bundles_post_ra>
// kernel: tpu_custom_call.1
= control target key start
LH: loop header
LB: loop body
LE: loop exit
PB: predicated region body
PF: predicated region fallthrough
CT: control target
= control target key end

     0   :  { %8 = vsyncpa [#allocation3], 0  ;;  %s798_s0 = inlined_call_operand.vmem [shape: f32[2,4,16], index: 0, kind: input, shape index: {}]   ;;  %s799_s1 = inlined_call_operand.hbm [shape: f32[8,37], index: 1, kind: input, shape index: {}]   ;;  %s800_s2 = inlined_call_operand.vmem [shape: f32[8,1], index: 2, kind: input, shape index: {}]   ;;  %s801_s3 = inlined_call_operand.hbm [shape: f32[2,8,16], index: 3, kind: output, shape index: {}]  }
   0x1   :  { %9 = vsyncpa [#allocation4], 0 }
   0x2   :  { %11 = vsyncpa [#allocation4 + $0x1], 0  ;;  %s653_s12 = smov 0   ;;  %s655_s13 = smov 0  }
   0x3   :  { %s657_s14 = smov 0   ;;  %s659_s15 = smov 0  }
   0x4 LB: > { %s674_s16 = sadd.s32 4294967295, %s616_s15   ;;  %s411_s17 = sadd.s32 4294967294, %s616_s15   ;;  %s616_s15 = sphi %s659_s15, %s817_s15   ;;  %s612_s14 = sphi %s657_s14, %s816_s14   ;;  %s608_s13 = sphi %s655_s13, %s815_s13   ;;  %s604_s12 = sphi %s653_s12, %s814_s12  }
   0x5   : > { %s678_s18 = sadd.s32 1, %s616_s15   ;;  %s92_s19 = sadd.s32 1, %s612_s14 }
   0x6   : > { %s89_s20 = ssub.s32 %s616_s15, %s678_s18  ;;  %p102_p0 = scmp.ne.s32.totalorder %s612_s14, %s608_s13 }
   0x7   : > { %p90_p1 = scmp.eq.s32.totalorder %s89_s20, 0  ;;  %p103_p2 = scmp.eq.s32.totalorder %s674_s16, 1 }
   0x8   : > { %p108_p3 = scmp.ne.s32.totalorder %s608_s13, %s604_s12  ;;  %p109_p4 = scmp.eq.s32.totalorder %s411_s17, 1 }
   0x9   : > { %s689_s21 = scalar_select %p90_p1, %s612_s14, %s92_s19  }
   0xa   : > { %p691_p5 = por %p103_p2, %p102_p0  ;;  %p695_p6 = por %p109_p4, %p108_p3 }
   0xb   : > { %p412_p7 = scmp.ge.s32.totalorder %s616_s15, 1  ;;  %p116_p8 = scmp.lt.s32.totalorder %s616_s15, 3 }
   0xc   : > { %s805_s22 = scalar_select %p691_p5, 1, 0 }
   0xd   : > { %s806_s23 = scalar_select %p695_p6, 1, 0 }
   0xe   : > { %p802_p9 = scmp.eq.s32.totalorder %s674_s16, 0  ;;  %p702_p10 = pnand %p412_p7, %p116_p8 }
   0xf   : > { %s618_s25 = smov [#allocation2]   ;;  %s522_s30 = scalar_lea.hbm %s799_s1, 128 }
  0x10   : > { %s807_s24 = scalar_select %p702_p10, 1, 0 }
  0x11   : > { %s129_s26 = sshll.u32 %s618_s25, 4  ;;  %p457_p11 = pneg %p702_p10  ;;  %s130_s26 = int_to_ptr.vmem [resolvable:$true] %s129_s26 }
  0x12   : > { %p523_p13 = scmp.ne.s32.totalorder %s799_s1, %s522_s30  ;;  %p529_p3 = scmp.lt.u32.totalorder %s522_s30, %s799_s1 }
  0x13   : > { %p710_p12 = pnand %p802_p9, %p457_p11 }
  0x15   : > { %p524_p0 = pneg %p710_p12 }
  0x17   : > { %p525_p1 = pnand %p524_p0, %p523_p13 }
  0x19   : > { %p526_p2 = pneg %p525_p1 }
  0x1b   : > { %p531_p4 = pnand %p529_p3, %p526_p2 }
  0x1d   : > { %534 = shalt.err (!%p531_p4)
}
  0x1e   : > { %s535_s8 = scalar_lea.vmem %s130_s26, 128  ;;  %p543_p9 = scmp.lt.s32.totalorder %s130_s26, %s130_s26 }
  0x1f   : > { %p536_p7 = scmp.ne.s32.totalorder %s130_s26, %s535_s8  ;;  %p544_p6 = scmp.lt.s32.totalorder %s535_s8, %s535_s8 }
  0x21   : > { %p538_p8 = pnand %p536_p7, %p524_p0  ;;  %p545_p5 = por %p544_p6, %p543_p9 }
  0x23   : > { %p539_p11 = pneg %p538_p8 }
  0x25   : > { %p546_p10 = pnand %p545_p5, %p539_p11 }
  0x27   : > { %549 = shalt.err (!%p546_p10)
}
  0x28   : > { %460 = dma.hbm_to_vmem [thread:$0]  (!%p710_p12), %s799_s1, 128, %s130_s26, [#allocation3]  }
  0x29   : > { %p809_p13 = scmp.ne.s32.totalorder %s807_s24, 0 }
  0x2a   : > { %p810_p1 = scmp.eq.s32.totalorder (!%p809_p13), %s674_s16, 0 }
  0x2b   : > { %152 = sbr.rel (%p809_p13) target bundleno = 596 (0x254), region = 32 }
  0x32   : > { %595 = dma.done.wait (%p810_p1), [#allocation3], 128   ;;  %p811_p0 = pmov %p810_p1 }
  0x33   : > { %p175_p6 = scmp.lt.s32.totalorder %s674_s16, 1  ;;  %s619_s26 = smov 4   ;;  %v620_v1 = vmov 0.0|0.0   ;;  %vm184_vm0 = vcmask 31744   ;;  %vm186_vm1 = vcmask 162816   ;;  %vm625_vm2 = vmmov 0  }
  0x34   : > { %597 = vsyncadd (%p811_p0), [#allocation3], 4294967168  ;;  %445 = vmatprep.subr.bf16.mxu0 %v620_v1  ;;  %s621_s24 = smov 124   ;;  %s622_s27 = smov 126   ;;  %v626_v6 = vmov 0.0   ;;  %v629_v7 = vmov 0  }
  0x35   : > { %s176_s11 = scalar_select %p175_p6, %s674_s16, 1  ;;  %442 = vmatprep.mubr.msk.f32.mxu0 %vm625_vm2, %v626_v6  ;;  %514 = vset.pattern.permute.xlu1 %v629_v7  ;;  %v311_v8 = vld [vmem:[%s800_s2] sm:$0xff]  ;;  %vm214_vm3 = vcmask 1043456   ;;  %vm225_vm4 = vcmask 1044480   ;;  %vm221_vm5 = vcmask 302080   ;;  %vm300_vm6 = vcmask 130048  }
  0x36   : > { %s623_s28 = smov 125   ;;  %s624_s29 = smov 127   ;;  %515 = vset.pattern.permute.xlu0 %v629_v7  ;;  %v220_v23 = vld [vmem:[#allocation2] sm:$0xff] }
  0x37   : > { %s418_s17 = sshll.u32 %s176_s11, 2  ;;  %s627_s30 = smov 123  }
  0x38   : > { %s178_s25 = scalar_lea.vmem %s798_s0, %s418_s17  ;;  %s628_s4 = smov 122  }
  0x39   : > { %v179_v0 = vld [vmem:[%s178_s25] sm:$0xf]  ;;  %s630_s5 = smov 121   ;;  %s631_s6 = smov 120  }
  0x3a   : > { %181 = vrot.lane.b32.xlu0 %v179_v0, %s619_s26  ;;  %s172_s9 = sand.u32 1, %s608_s13   ;;  %s423_s11 = sshll.u32 %s674_s16, 7 }
  0x3b   : > { %s417_s10 = sshll.u32 %s172_s9, 3  ;;  %s755_s26 = scalar_lea.hbm %s801_s3, %s423_s11 }
  0x3c   : > { %s174_s17 = scalar_lea.vmem [#allocation5], %s417_s10  ;;  %p812_p9 = scmp.ne.s32.totalorder %s805_s22, 0 }
  0x3d   : > { %s340_s19 = sshll.u32 %s174_s17, 4  ;;  %s632_s16 = smov [#allocation5]   ;;  %s757_s19 = int_to_ptr.vmem [resolvable:$true] %s340_s19 }
  0xac   : > { %v182_v2 = vpop.permute.xlu0 %181 }
  0xad   : > { %v185_v3 = vsel %vm184_vm0, 0.0, %v182_v2 }
  0xae   : > { %v187_v4 = vsel %vm186_vm1, %v185_v3, 0.0 }
  0xaf   : > { %199 = vrot.lane.b32.xlu0 %v187_v4, %s621_s24  ;;  %193 = vrot.lane.b32.xlu1 %v187_v4, %s622_s27  ;;  %v189_v5 = vrot.slane %v187_v4, 4  ;;  %s327_s24 = scalar_lea.sflag [#allocation4], %s172_s9  ;;  %s550_s27 = scalar_lea.vmem %s757_s19, 128 }
  0xb0   : > { %p551_p5 = scmp.ne.s32.totalorder %s757_s19, %s550_s27 }
  0xb2   : > { %p552_p10 = pnand %p551_p5, %p812_p9 }
  0xb3   : > { %196 = vrot.lane.b32.xlu1 %v189_v5, %s623_s28  ;;  %190 = vrot.lane.b32.xlu0 %v189_v5, %s624_s29  ;;  %s554_s28 = sshll.u32 %s632_s16, 4  ;;  %s555_s28 = int_to_ptr.vmem [resolvable:$false] %s554_s28 }
  0xb4   : > { %p553_p12 = pneg %p552_p10  ;;  %s556_s29 = scalar_lea.vmem %s555_s28, 256 }
  0xb5   : > { %p557_p2 = scmp.lt.s32.totalorder %s757_s19, %s555_s28  ;;  %p558_p3 = scmp.lt.s32.totalorder %s556_s29, %s550_s27 }
  0xb7   : > { %202 = vrot.lane.b32.xlu1 %v189_v5, %s627_s30  ;;  %205 = vrot.lane.b32.xlu0 %v187_v4, %s628_s4  ;;  %p559_p4 = por %p558_p3, %p557_p2 }
  0xb9   : > { %p560_p7 = pnand %p559_p4, %p553_p12 }
  0xbb   : > { %208 = vrot.lane.b32.xlu1 %v189_v5, %s630_s5  ;;  %211 = vrot.lane.b32.xlu0 %v187_v4, %s631_s6 }
  0xbf   : > { %314 = vperm.xlu1 %514, %v311_v8  }
 0x121   : > { %v200_v9 = vpop.permute.xlu0 %199  ;;  %v194_v10 = vpop.permute.xlu1 %193 }
 0x125   : > { %v197_v11 = vpop.permute.xlu1 %196  ;;  %v191_v12 = vpop.permute.xlu0 %190 }
 0x126   : > { %v216_v13 = vsel %vm214_vm3, %v194_v10, %v197_v11  ;;  %v215_v14 = vsel %vm214_vm3, %v187_v4, %v191_v12 }
 0x127   : > { %v446_v15 = vpack.c.bf16 %v216_v13, %v215_v14 }
 0x129   : > { %v203_v16 = vpop.permute.xlu1 %202  ;;  %447 = vmatpush3.bf16.msra.mxu0 %v446_v15  ;;  %v206_v17 = vpop.permute.xlu0 %205 }
 0x12a   : > { %448 = vmatprep.subr.bf16.mxu0 %v620_v1  ;;  %v217_v19 = vsel %vm214_vm3, %v200_v9, %v203_v16 }
 0x12d   : > { %v209_v18 = vpop.permute.xlu1 %208  ;;  %v212_v22 = vpop.permute.xlu0 %211 }
 0x12e   : > { %v218_v20 = vsel %vm214_vm3, %v206_v17, %v209_v18  ;;  %v219_v24 = vsel %vm214_vm3, %v212_v22, 1.0 }
 0x12f   : > { %v449_v21 = vpack.c.bf16 %v218_v20, %v217_v19 }
 0x131   : > { %450 = vmatpush3.bf16.msra.mxu0 %v449_v21 }
 0x132   : > { %440 = vmatprep.subr.mxu0 %v626_v6 }
 0x135   : > { %441 = vmatpush3.msk.msra.mxu0 %vm225_vm4, %v219_v24 }
 0x136   : > { %443 = vmatmul.mubr.msk.f32.vlgmr.msra.gmra.mrb[0].mxu0 %vm221_vm5, %v220_v23 }
 0x13e   : > { %v315_v37 = vpop.permute.xlu1 %314 }
 0x209   : > { %v295_v25 = vpop.f32.mrb[0].mxu0 }
 0x20a   : > { %v299_v26 = vmul.f32 %v295_v25, %v295_v25  ;;  %v444_v27 = vpop.f32.mrb[1].mxu0 }
 0x20c   : > { %v301_v28 = vsel %vm300_vm6, %v299_v26, 0.0 }
 0x20d   : > { %v302_v29 = vrot.slane %v301_v28, 4 }
 0x20f   : > { %v303_v30 = vadd.f32 %v302_v29, %v301_v28 }
 0x211   : > { %v304_v31 = vrot.slane %v303_v30, 2 }
 0x213   : > { %v305_v32 = vadd.f32 %v304_v31, %v303_v30 }
 0x215   : > { %v306_v33 = vrot.slane %v305_v32, 1 }
 0x217   : > { %v307_v34 = vadd.f32 %v306_v33, %v305_v32 }
 0x219   : > { %v308_v35 = vmax.f32 %v307_v34, 1e-24 }
 0x21b   : > { %516 = vrsqrt.f32 %v308_v35 }
 0x225   : > { %v517_v36 = vpop.eup %516 }
 0x226   : > { %v310_v38 = vmul.f32 %v517_v36, %v295_v25 }
 0x228   : > { %v317_v39 = vmul.f32 %v315_v37, %v310_v38 }
 0x22a   : > { %v421_v40 = vmul.f32 -1.442695, %v317_v39 }
 0x22c   : > { %518 = vpow2.f32 %v421_v40 }
 0x236   : > { %v519_v41 = vpop.eup %518 }
 0x237   : > { %v321_v42 = vadd.f32 1.0, %v519_v41 }
 0x239   : > { %520 = vrcp.f32 %v321_v42 }
 0x243   : > { %v521_v43 = vpop.eup %520 }
 0x244   : > { %v324_v44 = vmul.f32 %v521_v43, %v317_v39 }
 0x246   : > { %325 = vst.msk [vmem:[%s174_s17] sm:$0xff] %vm300_vm6, %v324_v44 }
 0x247   : > { %563 = shalt.err (!%p560_p7)
}
 0x248   : > { %s564_s30 = scalar_lea.hbm %s755_s26, 128  ;;  %s568_s6 = scalar_lea.hbm %s801_s3, 256 }
 0x249   : > { %p565_p8 = scmp.ne.s32.totalorder %s755_s26, %s564_s30  ;;  %p569_p1 = scmp.lt.u32.totalorder %s755_s26, %s801_s3 }
 0x24a   : > { %p570_p0 = scmp.lt.u32.totalorder %s568_s6, %s564_s30  ;;  %p572_p5 = scmp.lt.u32.totalorder %s564_s30, %s755_s26 }
 0x24b   : > { %p566_p11 = pnand %p565_p8, %p812_p9 }
 0x24c   : > { %p571_p6 = por %p570_p0, %p569_p1 }
 0x24d   : > { %p567_p13 = pneg %p566_p11 }
 0x24e   : > { %p573_p10 = por %p572_p5, %p571_p6 }
 0x250   : > { %p574_p12 = pnand %p573_p10, %p567_p13 }
 0x252   : > { %577 = shalt.err (!%p574_p12)
}
 0x253   : > { %455 = dma.vmem_to_hbm [thread:$0]  (%p812_p9), %s757_s19, 128, %s755_s26, %s327_s24  }
 0x254 PF: > { %p467_p2 = scmp.ge.s32.totalorder %s616_s15, 2  ;;  %s352_s9 = sand.u32 1, %s604_s12  }
 0x255   : > { %p813_p3 = scmp.ne.s32.totalorder %s806_s23, 0  ;;  %s353_s10 = scalar_lea.sflag [#allocation4], %s352_s9 }
 0x257   : > { %p462_p4 = pnand %p467_p2, %p813_p3 }
 0x259   : > { %599 = dma.done.wait (!%p462_p4), %s353_s10, 128  }
 0x25a   : > { %601 = vsyncadd (!%p462_p4), %s353_s10, 4294967168  ;;  %p14_p7 = scmp.ge.s32.totalorder %s678_s18, 4   ;;  %s814_s12 = smov %s608_s13 }
 0x25b   : > { %s815_s13 = smov %s612_s14  ;;  %s816_s14 = smov %s689_s21 }
 0x25c   : > { %s817_s15 = smov %s678_s18  ;;  %16 = sbr.rel (!%p14_p7) target bundleno = 4 (0x4), region = 72 }
 0x263   :  { %358 = vsyncpa [#allocation3], 1 }
 0x264   :  { %360 = vsyncpa [#allocation3 + $0x1], 1 }
 0x265   :  { %361 = vsyncpa [#allocation4], 1 }
 0x266   :  { %363 = vsyncpa [#allocation4 + $0x1], 1 }

</bundles_post_ra>
